<compile_context>
chip_gen: v7x
topology: tpu7x:2x2x1
jax: 0.10.0
libtpu: 0.0.40
codegen_flags: <defaults>
</compile_context>

<pallas_src>
import jax
import jax.numpy as jnp
from jax.experimental import pallas as pl
from jax.experimental.pallas import tpu as pltpu


def _identity_dma_kernel(x_hbm, o_hbm, sem):
    # Whole-array HBM -> HBM copy. Both refs live in HBM (memory_space=pl.ANY),
    # so data never touches VMEM and no per-tile pipeline overhead is paid.
    cp = pltpu.make_async_copy(x_hbm, o_hbm, sem)
    cp.start()
    cp.wait()


def clip1_forward(x):
    """Pallas implementation of CLIP1.forward (identity).

    Works for any shape / dtype / batch size: the kernel is a single
    full-array DMA, so there are no (8,128) tile or divisibility
    requirements and no per-generation VMEM sizing concerns.
    """
    return pl.pallas_call(
        _identity_dma_kernel,
        out_shape=jax.ShapeDtypeStruct(x.shape, x.dtype),
        in_specs=[pl.BlockSpec(memory_space=pl.ANY)],
        out_specs=pl.BlockSpec(memory_space=pl.ANY),
        scratch_shapes=[pltpu.SemaphoreType.DMA],
    )(x)


class CLIP1:
    """JAX mirror of the PyTorch CLIP1 module (no parameters; identity)."""

    def __init__(self, input_dim):
        self.input_dim = input_dim  # kept for API parity; unused (no weights)

    def __call__(self, x):
        return clip1_forward(x)


if __name__ == "__main__":
    # Real module uses input_dim = 77 * 768 (flattened (seq, hidden) CLIP text
    # embedding). Use a small consistent stand-in: batch=2, seq=8, hidden=32.
    batch, seq, hidden = 2, 8, 32
    features = seq * hidden  # 256
    model = CLIP1(input_dim=features)

    key = jax.random.PRNGKey(0)
    x = jax.random.normal(key, (batch, features), dtype=jnp.float32)

    y = model(x)
    y = jax.block_until_ready(y)

    assert y.shape == x.shape and y.dtype == x.dtype
    assert bool(jnp.all(y == x))
    print("KERNEL_OK")
</pallas_src>

<mosaic_0001>
module attributes {stable_mosaic.version = 11 : i64} {
  func.func @_identity_dma_kernel(%arg0: memref<2x256xf32, #tpu.memory_space<any>>, %arg1: memref<2x256xf32, #tpu.memory_space<any>>, %arg2: memref<!tpu.dma_semaphore, #tpu.memory_space<semaphore_mem>>) attributes {dimension_semantics = [], scalar_prefetch = 0 : i64, scratch_operands = 1 : i64, tpu.core_type = #tpu.core_type<tc>} {
    tpu.enqueue_dma source(%arg0 : memref<2x256xf32, #tpu.memory_space<any>>) target(%arg1 : memref<2x256xf32, #tpu.memory_space<any>>) target_semaphore(%arg2 : memref<!tpu.dma_semaphore, #tpu.memory_space<semaphore_mem>>)
    tpu.wait_dma2 semaphore(%arg2 : memref<!tpu.dma_semaphore, #tpu.memory_space<semaphore_mem>>) src(%arg0 : memref<2x256xf32, #tpu.memory_space<any>>) dst(%arg1 : memref<2x256xf32, #tpu.memory_space<any>>)
    return
  }
}

</mosaic_0001>

<bundles_post_ra>
// kernel: tpu_custom_call.1
= control target key start
LH: loop header
LB: loop body
LE: loop exit
PB: predicated region body
PF: predicated region fallthrough
CT: control target
= control target key end

     0   :  { %s35_s6 = smov [#allocation2]   ;;  %s36_s7 = smov [#allocation3]   ;;  %s54_s0 = inlined_call_operand.hbm [shape: f32[2,256], index: 0, kind: input, shape index: {}]   ;;  %s55_s1 = inlined_call_operand.hbm [shape: f32[2,256], index: 1, kind: output, shape index: {}]  }
   0x1   :  { %s37_s8 = smov 0  }
   0x2   :  { %18 = dma.general %s54_s0, 64, %s55_s1, %s35_s6, %s36_s7, [#allocation4], %s37_s8, 0  }
   0x3   :  { %33 = dma.done.wait [#allocation2], 64 }
   0x4   :  { %34 = vsyncadd [#allocation2], 4294967232 }
   0x5   :  { %23 = vsyncmov [#allocation2] }
   0x8   :  { %s24_s13 = vpop.sfrf %23 }
   0x9   :  { %p29_p0 = scmp.ne.s32.totalorder %s24_s13, 0 }
   0xb   :  { %28 = shalt.err (%p29_p0)  }

</bundles_post_ra>
